<compile_context>
chip_gen: v6e
topology: v6e:2x2x1
jax: 0.10.0
libtpu: 0.0.40
codegen_flags: <defaults>
</compile_context>

<pallas_src>
import jax
import jax.numpy as jnp
from jax.experimental import pallas as pl
from jax.experimental.pallas import tpu as pltpu

HIDDEN = 128            # fc1 output width (fixed by the PyTorch module)
SMALL_BATCH = 256       # below this, use a single grid step (DDPG act() calls)
MAX_BATCH_TILE = 4096   # rows per grid step; ~10-12 MiB VMEM footprint (see below)
VMEM_LIMIT_BYTES = 32 * 1024 * 1024  # explicit scoped-VMEM limit (v5e default is 16 MiB)


def _round_up(x, m):
    return ((x + m - 1) // m) * m


def _choose_batch_tile(B):
    """Pick the batch tile TB.

    Tiny batches: one grid step (block == full extent, always legal).
    Larger batches: guarantee >= 2 grid steps (so the 'parallel' batch axis can
    shard across both v7x TensorCores) while capping the per-step VMEM footprint.
    TB is a multiple of 8; the partial last tile is masked by Pallas.
    """
    if B <= SMALL_BATCH:
        return B
    return min(MAX_BATCH_TILE, _round_up(pl.cdiv(B, 2), 8))


def actor_kernel(x_ref, w1_ref, b1_ref, w2_ref, b2_ref, o_ref):
    # fc1 + ReLU (MXU matmul, f32 accumulate)
    x = x_ref[...]                                                    # (TB, S)
    h = jnp.dot(x, w1_ref[...], preferred_element_type=jnp.float32)   # (TB, 128)
    h = jnp.maximum(h + b1_ref[...], 0.0)                             # (1,128) bias broadcast
    # Dropout(0.5): identity in eval mode.
    # TODO(synk): training-mode stochastic dropout (pltpu.prng_random_bits) not emitted here.
    # fc2 + tanh, stored directly at the true action width (masked vst, lane-padded only in VMEM)
    y = jnp.dot(h, w2_ref[...], preferred_element_type=jnp.float32)   # (TB, A)
    o_ref[...] = jnp.tanh(y + b2_ref[...])

    # Note: for a partial last batch tile the padded input rows hold garbage;
    # they are computed but masked on store by Pallas (benign / standard).


def actor_forward(state, w1, b1, w2, b2):
    """state: (B, state_dim). w1: (state_dim, 128), b1: (128,) or (1,128),
    w2: (128, action_dim), b2: (action_dim,) or (1,action_dim).
    Returns (B, action_dim) f32."""
    B, S = state.shape
    H = w1.shape[1]
    A = w2.shape[1]
    assert H == HIDDEN and w2.shape[0] == HIDDEN

    # Explicit f32 (mixing a bf16 state into jnp.dot would silently change semantics).
    state = state.astype(jnp.float32)
    w1 = w1.astype(jnp.float32)
    w2 = w2.astype(jnp.float32)
    # Bias reshape to 2D is a free metadata op (the costly per-call lane padding is gone).
    b1_2d = b1.astype(jnp.float32).reshape(1, H)
    b2_2d = b2.astype(jnp.float32).reshape(1, A)

    TB = _choose_batch_tile(B)
    grid = (pl.cdiv(B, TB),)

    cost = pl.CostEstimate(
        flops=2 * B * (S * H + H * A),
        transcendentals=B * A,  # tanh
        bytes_accessed=4 * (B * S + S * H + H + H * A + A + B * A),
    )

    out = pl.pallas_call(
        actor_kernel,
        out_shape=jax.ShapeDtypeStruct((B, A), jnp.float32),
        grid=grid,
        in_specs=[
            pl.BlockSpec((TB, S), lambda i: (i, 0)),   # streamed activations
            pl.BlockSpec((S, H), lambda i: (0, 0)),    # resident weights / biases
            pl.BlockSpec((1, H), lambda i: (0, 0)),
            pl.BlockSpec((H, A), lambda i: (0, 0)),    # last dim == full extent -> legal
            pl.BlockSpec((1, A), lambda i: (0, 0)),
        ],
        out_specs=pl.BlockSpec((TB, A), lambda i: (i, 0)),  # lane-narrow but true-width store
        compiler_params=pltpu.CompilerParams(
            dimension_semantics=("parallel",),
            vmem_limit_bytes=VMEM_LIMIT_BYTES,
        ),
        cost_estimate=cost,
    )(state, w1, b1_2d, w2, b2_2d)

    return out


def init_params(key, state_dim, action_dim, hidden=HIDDEN):
    """Deterministic PyTorch-style Linear init (uniform +/- 1/sqrt(fan_in)).
    Weights stored as (in, out) = transposed relative to nn.Linear."""
    k1, k2, k3, k4 = jax.random.split(key, 4)
    bound1 = 1.0 / jnp.sqrt(jnp.float32(state_dim))
    bound2 = 1.0 / jnp.sqrt(jnp.float32(hidden))
    w1 = jax.random.uniform(k1, (state_dim, hidden), jnp.float32, -bound1, bound1)
    b1 = jax.random.uniform(k2, (hidden,), jnp.float32, -bound1, bound1)
    w2 = jax.random.uniform(k3, (hidden, action_dim), jnp.float32, -bound2, bound2)
    b2 = jax.random.uniform(k4, (action_dim,), jnp.float32, -bound2, bound2)
    return w1, b1, w2, b2


if __name__ == "__main__":
    key = jax.random.PRNGKey(0)
    batch, state_dim, action_dim = 2, 16, 8

    k_state, k_params = jax.random.split(key)
    state = jax.random.normal(k_state, (batch, state_dim), jnp.float32)
    w1, b1, w2, b2 = init_params(k_params, state_dim, action_dim)

    out = actor_forward(state, w1, b1, w2, b2)
    out = jax.block_until_ready(out)

    # Pure-JAX reference (eval mode: dropout = identity).
    ref = jnp.tanh(jnp.maximum(state @ w1 + b1, 0.0) @ w2 + b2)
    assert out.shape == (batch, action_dim)
    assert jnp.allclose(out, ref, atol=1e-5, rtol=1e-5)

    # Multi-tile path: exercises the grid split (>=2 steps), partial-tile masking,
    # and the true-width (non-padded) output stores.
    big_B = 2048 + 13
    big_state = jax.random.normal(jax.random.PRNGKey(1), (big_B, state_dim), jnp.float32)
    big_out = jax.block_until_ready(actor_forward(big_state, w1, b1, w2, b2))
    big_ref = jnp.tanh(jnp.maximum(big_state @ w1 + b1, 0.0) @ w2 + b2)
    assert big_out.shape == (big_B, action_dim)
    assert jnp.allclose(big_out, big_ref, atol=1e-5, rtol=1e-5)

    # Very large batch: exercises MAX_BATCH_TILE capping and pipeline streaming.
    huge_B = 3 * MAX_BATCH_TILE + 5
    huge_state = jax.random.normal(jax.random.PRNGKey(2), (huge_B, state_dim), jnp.float32)
    huge_out = jax.block_until_ready(actor_forward(huge_state, w1, b1, w2, b2))
    huge_ref = jnp.tanh(jnp.maximum(huge_state @ w1 + b1, 0.0) @ w2 + b2)
    assert huge_out.shape == (huge_B, action_dim)
    assert jnp.allclose(huge_out, huge_ref, atol=1e-5, rtol=1e-5)

    print("KERNEL_OK")
</pallas_src>

<mosaic_0001>
module attributes {stable_mosaic.version = 11 : i64} {
  func.func @actor_kernel(%arg0: i32, %arg1: memref<2x16xf32, #tpu.memory_space<vmem>>, %arg2: memref<16x128xf32, #tpu.memory_space<vmem>>, %arg3: memref<1x128xf32, #tpu.memory_space<vmem>>, %arg4: memref<128x8xf32, #tpu.memory_space<vmem>>, %arg5: memref<1x8xf32, #tpu.memory_space<vmem>>, %arg6: memref<2x8xf32, #tpu.memory_space<vmem>>) attributes {dimension_semantics = [#tpu.dimension_semantics<parallel>], iteration_bounds = array<i64: 1>, scalar_prefetch = 0 : i64, scratch_operands = 0 : i64, tpu.core_type = #tpu.core_type<tc>, window_params = [{transform_indices = @transform_0, window_bounds = array<i64: 2, 16>}, {pipeline_mode = #tpu.pipeline_mode<synchronous>, transform_indices = @transform_1, window_bounds = array<i64: 16, 128>}, {pipeline_mode = #tpu.pipeline_mode<synchronous>, transform_indices = @transform_2, window_bounds = array<i64: 1, 128>}, {pipeline_mode = #tpu.pipeline_mode<synchronous>, transform_indices = @transform_3, window_bounds = array<i64: 128, 8>}, {pipeline_mode = #tpu.pipeline_mode<synchronous>, transform_indices = @transform_4, window_bounds = array<i64: 1, 8>}, {transform_indices = @transform_5, window_bounds = array<i64: 2, 8>}]} {
    %c0 = arith.constant 0 : index
    %c0_0 = arith.constant 0 : index
    %0 = vector.load %arg1[%c0, %c0_0] : memref<2x16xf32, #tpu.memory_space<vmem>>, vector<2x16xf32>
    %c0_1 = arith.constant 0 : index
    %c0_2 = arith.constant 0 : index
    %1 = vector.load %arg2[%c0_1, %c0_2] : memref<16x128xf32, #tpu.memory_space<vmem>>, vector<16x128xf32>
    %cst = arith.constant dense<0.000000e+00> : vector<2x128xf32>
    %2 = tpu.matmul %0, %1, %cst {dimension_numbers = #tpu.dot_dimension_numbers<[1], [0], [0], [1], [0, 0, 1, 1], [], []>} : vector<2x16xf32>, vector<16x128xf32>, vector<2x128xf32> -> vector<2x128xf32>
    %c0_3 = arith.constant 0 : index
    %c0_4 = arith.constant 0 : index
    %3 = vector.load %arg3[%c0_3, %c0_4] : memref<1x128xf32, #tpu.memory_space<vmem>>, vector<1x128xf32>
    %4 = vector.broadcast %3 : vector<1x128xf32> to vector<2x128xf32>
    %5 = arith.addf %2, %4 : vector<2x128xf32>
    %cst_5 = arith.constant 0.000000e+00 : f32
    %6 = vector.broadcast %cst_5 : f32 to vector<2x128xf32>
    %7 = arith.maximumf %5, %6 : vector<2x128xf32>
    %c0_6 = arith.constant 0 : index
    %c0_7 = arith.constant 0 : index
    %8 = vector.load %arg4[%c0_6, %c0_7] : memref<128x8xf32, #tpu.memory_space<vmem>>, vector<128x8xf32>
    %cst_8 = arith.constant dense<0.000000e+00> : vector<2x8xf32>
    %9 = tpu.matmul %7, %8, %cst_8 {dimension_numbers = #tpu.dot_dimension_numbers<[1], [0], [0], [1], [0, 0, 1, 1], [], []>} : vector<2x128xf32>, vector<128x8xf32>, vector<2x8xf32> -> vector<2x8xf32>
    %c0_9 = arith.constant 0 : index
    %c0_10 = arith.constant 0 : index
    %10 = vector.load %arg5[%c0_9, %c0_10] : memref<1x8xf32, #tpu.memory_space<vmem>>, vector<1x8xf32>
    %11 = vector.broadcast %10 : vector<1x8xf32> to vector<2x8xf32>
    %12 = arith.addf %9, %11 : vector<2x8xf32>
    %13 = math.tanh %12 : vector<2x8xf32>
    %c0_11 = arith.constant 0 : index
    %c0_12 = arith.constant 0 : index
    %14 = vector.load %arg6[%c0_11, %c0_12] : memref<2x8xf32, #tpu.memory_space<vmem>>, vector<2x8xf32>
    tpu.vector_store %arg6[%c0_11, %c0_12], %13 {strides = array<i32>} : memref<2x8xf32, #tpu.memory_space<vmem>>, vector<2x8xf32>,
    return
  }
  func.func @transform_0(%arg0: i32) -> (i32, i32) {
    %c0_i32 = arith.constant 0 : i32
    %c0_i32_0 = arith.constant 0 : i32
    return %arg0, %c0_i32 : i32, i32
  }
  func.func @transform_1(%arg0: i32) -> (i32, i32) {
    %c0_i32 = arith.constant 0 : i32
    %c0_i32_0 = arith.constant 0 : i32
    %c0_i32_1 = arith.constant 0 : i32
    return %c0_i32, %c0_i32_0 : i32, i32
  }
  func.func @transform_2(%arg0: i32) -> (i32, i32) {
    %c0_i32 = arith.constant 0 : i32
    %c0_i32_0 = arith.constant 0 : i32
    %c0_i32_1 = arith.constant 0 : i32
    return %c0_i32, %c0_i32_0 : i32, i32
  }
  func.func @transform_3(%arg0: i32) -> (i32, i32) {
    %c0_i32 = arith.constant 0 : i32
    %c0_i32_0 = arith.constant 0 : i32
    %c0_i32_1 = arith.constant 0 : i32
    return %c0_i32, %c0_i32_0 : i32, i32
  }
  func.func @transform_4(%arg0: i32) -> (i32, i32) {
    %c0_i32 = arith.constant 0 : i32
    %c0_i32_0 = arith.constant 0 : i32
    %c0_i32_1 = arith.constant 0 : i32
    return %c0_i32, %c0_i32_0 : i32, i32
  }
  func.func @transform_5(%arg0: i32) -> (i32, i32) {
    %c0_i32 = arith.constant 0 : i32
    %c0_i32_0 = arith.constant 0 : i32
    return %arg0, %c0_i32 : i32, i32
  }
}

</mosaic_0001>

<bundles_post_ra>
// kernel: tpu_custom_call.1
= control target key start
LH: loop header
LB: loop body
LE: loop exit
PB: predicated region body
PF: predicated region fallthrough
CT: control target
= control target key end

     0   :  { %v308_v1 = vmov 0.0   ;;  %vm309_vm0 = vmmov 0   ;;  %vm31_vm1 = vcmask 130048   ;;  %s409_s0 = inlined_call_operand.vmem [shape: f32[2,16], index: 0, kind: input, shape index: {}]   ;;  %s410_s1 = inlined_call_operand.vmem [shape: f32[16,128], index: 1, kind: input, shape index: {}]   ;;  %s411_s2 = inlined_call_operand.vmem [shape: f32[1,128], index: 2, kind: input, shape index: {}]   ;;  %s412_s3 = inlined_call_operand.vmem [shape: f32[128,8], index: 3, kind: input, shape index: {}]   ;;  %s413_s4 = inlined_call_operand.vmem [shape: f32[1,8], index: 4, kind: input, shape index: {}]   ;;  %s414_s5 = inlined_call_operand.hbm [shape: f32[2,8], index: 5, kind: output, shape index: {}]  }
   0x1   :  { %v23_v0 = vld [vmem:[%s410_s1 + $0x8] sm:$0xff]  ;;  %239 = vmatprep.subr.mxu0 %v308_v1  ;;  %v22_v2 = vld [vmem:[%s410_s1] sm:$0xff]  ;;  %243 = vmatprep.mubr.msk.f32.mxu0 %vm309_vm0, %v308_v1  ;;  %v121_v3 = vld [vmem:[%s412_s3 + $0x78] sm:$0xff] }
   0x2   :  { %240 = vmatpush3.msra.mxu0 %v23_v0  ;;  %v21_v4 = vld [vmem:[%s409_s0] sm:$0x3]  ;;  %246 = vmatprep.subr.mxu1 %v308_v1  ;;  %v120_v5 = vld [vmem:[%s412_s3 + $0x70] sm:$0xff]  ;;  %v119_v6 = vld [vmem:[%s412_s3 + $0x68] sm:$0xff] }
   0x3   :  { %241 = vmatprep.subr.mxu0 %v308_v1  ;;  %247 = vmatpush3.msra.mxu1 %v121_v3 }
   0x4   :  { %242 = vmatpush3.msra.mxu0 %v22_v2  ;;  %248 = vmatprep.subr.mxu1 %v308_v1 }
   0x5   :  { %244 = vmatmul.mubr.msk.f32.vlgmr.msra.gmra.mxu0 %vm31_vm1, %v21_v4  ;;  %249 = vmatpush3.msra.mxu1 %v120_v5 }
   0x6   :  { %10 = vsyncpa [#allocation3], 0  ;;  %250 = vmatprep.subr.mxu1 %v308_v1  ;;  %v118_v7 = vld [vmem:[%s412_s3 + $0x60] sm:$0xff]  ;;  %278 = vmatprep.mubr.msk.f32.mxu1 %vm309_vm0, %v308_v1  ;;  %v117_v8 = vld [vmem:[%s412_s3 + $0x58] sm:$0xff]  ;;  %s310_s6 = smov [#allocation2]   ;;  %vm200_vm2 = vcmask 58368  }
   0x7   :  { %251 = vmatpush3.msra.mxu1 %v119_v6  ;;  %v116_v9 = vld [vmem:[%s412_s3 + $0x50] sm:$0xff]  ;;  %v115_v10 = vld [vmem:[%s412_s3 + $0x48] sm:$0xff]  ;;  %v114_v11 = vld [vmem:[%s412_s3 + $0x40] sm:$0xff] }
   0x8   :  { %252 = vmatprep.subr.mxu1 %v308_v1  ;;  %v113_v12 = vld [vmem:[%s412_s3 + $0x38] sm:$0xff]  ;;  %v112_v13 = vld [vmem:[%s412_s3 + $0x30] sm:$0xff]  ;;  %v111_v14 = vld [vmem:[%s412_s3 + $0x28] sm:$0xff] }
   0x9   :  { %253 = vmatpush3.msra.mxu1 %v118_v7  ;;  %v110_v15 = vld [vmem:[%s412_s3 + $0x20] sm:$0xff]  ;;  %v109_v16 = vld [vmem:[%s412_s3 + $0x18] sm:$0xff]  ;;  %v108_v17 = vld [vmem:[%s412_s3 + $0x10] sm:$0xff] }
   0xa   :  { %254 = vmatprep.subr.mxu1 %v308_v1  ;;  %v107_v18 = vld [vmem:[%s412_s3 + $0x8] sm:$0xff]  ;;  %v106_v19 = vld [vmem:[%s412_s3] sm:$0xff]  ;;  %s208_s3 = sshll.u32 %s310_s6, 4  ;;  %s209_s3 = int_to_ptr.vmem [resolvable:$true] %s208_s3 }
   0xb   :  { %255 = vmatpush3.msra.mxu1 %v117_v8  ;;  %v216_v20 = vld [vmem:[%s411_s2] ss:$0 sm:$0xff]  ;;  %s286_s2 = scalar_lea.vmem %s209_s3, 32  ;;  %p291_p1 = scmp.lt.s32.totalorder %s209_s3, %s209_s3 }
   0xc   :  { %256 = vmatprep.subr.mxu1 %v308_v1  ;;  %v218_v25 = vld [vmem:[%s413_s4] ss:$0 sm:$0xff]  ;;  %p287_p0 = scmp.ne.s32.totalorder %s209_s3, %s286_s2  ;;  %p292_p2 = scmp.lt.s32.totalorder %s286_s2, %s286_s2 }
   0xd   :  { %257 = vmatpush3.msra.mxu1 %v116_v9 }
   0xe   :  { %258 = vmatprep.subr.mxu1 %v308_v1  ;;  %p293_p3 = por %p292_p2, %p291_p1 }
   0xf   :  { %259 = vmatpush3.msra.mxu1 %v115_v10 }
  0x10   :  { %260 = vmatprep.subr.mxu1 %v308_v1  ;;  %p294_p4 = pnand %p293_p3, %p287_p0 }
  0x11   :  { %261 = vmatpush3.msra.mxu1 %v114_v11 }
  0x12   :  { %262 = vmatprep.subr.mxu1 %v308_v1 }
  0x13   :  { %263 = vmatpush3.msra.mxu1 %v113_v12 }
  0x14   :  { %264 = vmatprep.subr.mxu1 %v308_v1 }
  0x15   :  { %265 = vmatpush3.msra.mxu1 %v112_v13 }
  0x16   :  { %266 = vmatprep.subr.mxu1 %v308_v1 }
  0x17   :  { %267 = vmatpush3.msra.mxu1 %v111_v14 }
  0x18   :  { %268 = vmatprep.subr.mxu1 %v308_v1 }
  0x19   :  { %269 = vmatpush3.msra.mxu1 %v110_v15 }
  0x1a   :  { %270 = vmatprep.subr.mxu1 %v308_v1 }
  0x1b   :  { %271 = vmatpush3.msra.mxu1 %v109_v16 }
  0x1c   :  { %272 = vmatprep.subr.mxu1 %v308_v1 }
  0x1d   :  { %273 = vmatpush3.msra.mxu1 %v108_v17 }
  0x1e   :  { %274 = vmatprep.subr.mxu1 %v308_v1 }
  0x1f   :  { %275 = vmatpush3.msra.mxu1 %v107_v18 }
  0x20   :  { %276 = vmatprep.subr.mxu1 %v308_v1 }
  0x21   :  { %277 = vmatpush3.msra.mxu1 %v106_v19 }
  0xc5   :  { %v101_v21 = vpop.f32.mrf.mxu0 }
  0xc6   :  { %v102_v22 = vadd.f32 %v216_v20, %v101_v21 }
  0xc7   :  { %v245_v23 = vpop.f32.mrf.mxu0 }
  0xc8   :  { %v105_v24 = vmax.f32 %v102_v22, 0.0 }
  0xca   :  { %279 = vmatmul.mubr.f32.vlgmr.msra.gmra.mxu1 %v105_v24 }
 0x18a   :  { %v195_v26 = vpop.f32.mrf.mxu1 }
 0x18b   :  { %v196_v27 = vadd.f32 %v218_v25, %v195_v26 }
 0x18c   :  { %v280_v28 = vpop.f32.mrf.mxu1 }
 0x18d   :  { %284 = vtanh.f32 %v196_v27 }
 0x19a   :  { %v285_v29 = vpop.eup %284 }
 0x19b   :  { %201 = vst.msk [vmem:[#allocation2] sm:$0x3] %vm200_vm2, %v285_v29 }
 0x19c   :  { %297 = shalt.err (!%p294_p4)
}
 0x19d   :  { %211 = dma.vmem_to_hbm [thread:$0]  %s209_s3, 32, %s414_s5, [#allocation3]  }
 0x19e   :  { %306 = dma.done.wait [#allocation3], 32  }
 0x19f   :  { %307 = vsyncadd [#allocation3], 4294967264 }
 0x1a0   :  { %215 = vsyncpa [#allocation3], 1 }

</bundles_post_ra>
